<compile_context>
chip_gen: v7x
topology: tpu7x:2x2x1
jax: 0.10.0
libtpu: 0.0.40
codegen_flags: <defaults>
</compile_context>

<pallas_src>
import functools

import jax
import jax.numpy as jnp
from jax.experimental import pallas as pl
from jax.experimental.pallas import tpu as pltpu


def _prompt_kernel(ppg_ref, prompt_ref, o_ref, *, glonorm, global_coeff, x_min, x_max):
    """prompted = ppg + global_coeff * (optionally global-normalized) prompt.

    ppg_ref:    (TB, D) VMEM batch tile
    prompt_ref: (1, D)  VMEM shared learnable prompt row (resident across grid steps)
    o_ref:      (TB, D) VMEM output tile
    """
    # All prompt-row math on the (1, D) row in f32 (cheap: one XLU reduce + a few row ops,
    # hidden under the tile DMA). The broadcast-add then runs in the input/output dtype,
    # so bf16 inputs would stay bf16 on the (TB, D) slab.
    p = prompt_ref[...].astype(jnp.float32)                 # (1, D)

    if glonorm:
        p_max = jnp.max(p, axis=-1, keepdims=True)          # (1, 1)
        p_min = jnp.min(p, axis=-1, keepdims=True)          # (1, 1)
        scale = (x_max - x_min) / (p_max - p_min)
        p = scale * (p - p_min) + x_min

    # Fold global_coeff into the (1, D) row so the (TB, D) work is a single broadcast add.
    p_scaled = (global_coeff * p).astype(o_ref.dtype)       # (1, D)
    o_ref[...] = (ppg_ref[...] + p_scaled).astype(o_ref.dtype)


def _pick_batch_tile(bz, data_dim, itemsize):
    """Largest batch tile (multiple of 8) whose double-buffered in/out copies fit VMEM.

    Budget ~ 2x(in tile) + 2x(out tile) + prompt row; target per-tile slab ~8 MiB so total
    stays ~32 MiB — comfortable even on v7x's 64 MiB physical VMEM.
    """
    bytes_per_row = max(data_dim * itemsize, 1)
    target_tile_bytes = 8 * 1024 * 1024
    tb = target_tile_bytes // bytes_per_row
    if tb >= bz:
        return int(bz)                     # whole batch in one block (full-dim block is legal)
    return int(max(8, (tb // 8) * 8))      # multiple of 8; ragged last block handled by Pallas


def prompt_forward(ppg, prompt, *, glonorm, global_coeff, x_min, x_max):
    """ppg: (bz, 1, data_dim); prompt: (1, data_dim)."""
    bz, ch, data_dim = ppg.shape
    assert ch == 1
    # NOTE: keep data_dim a multiple of 128 for lane-dense (unmasked) stores; a full-dim
    # last block is still legal otherwise, just slower. Pad in the caller if needed.
    ppg2d = ppg.reshape(bz, data_dim)

    itemsize = jnp.dtype(ppg.dtype).itemsize
    tb = _pick_batch_tile(bz, data_dim, itemsize)
    grid = (pl.cdiv(bz, tb),)

    # Explicit scoped-VMEM budget: 2x in-tile + 2x out-tile + prompt row + headroom,
    # capped well under v7x's 64 MiB physical VMEM.
    tile_bytes = tb * data_dim * itemsize
    vmem_limit = min(max(4 * tile_bytes + 2 * data_dim * 4 + (2 << 20), 16 << 20), 48 << 20)

    kernel = functools.partial(
        _prompt_kernel,
        glonorm=glonorm,
        global_coeff=float(global_coeff),
        x_min=float(x_min),
        x_max=float(x_max),
    )

    out2d = pl.pallas_call(
        kernel,
        out_shape=jax.ShapeDtypeStruct((bz, data_dim), ppg.dtype),
        grid_spec=pltpu.PrefetchScalarGridSpec(
            num_scalar_prefetch=0,
            grid=grid,
            in_specs=[
                pl.BlockSpec((tb, data_dim), lambda i: (i, 0)),   # ppg batch tile
                pl.BlockSpec((1, data_dim), lambda i: (0, 0)),    # prompt row (resident)
            ],
            out_specs=pl.BlockSpec((tb, data_dim), lambda i: (i, 0)),
        ),
        compiler_params=pltpu.CompilerParams(
            dimension_semantics=("parallel",),   # batch tiles independent -> megacore-shardable
            vmem_limit_bytes=int(vmem_limit),
        ),
    )(ppg2d, prompt)

    return out2d.reshape(bz, 1, data_dim)


def prompt_forward_ref(ppg, prompt, *, glonorm, global_coeff, x_min, x_max):
    """Pure-JAX reference mirroring the PyTorch forward."""
    bz = ppg.shape[0]
    p = jnp.broadcast_to(prompt[None, :, :], (bz,) + prompt.shape)   # (bz, 1, D)
    if glonorm:
        p_max = jnp.max(p, axis=-1, keepdims=True)
        p_min = jnp.min(p, axis=-1, keepdims=True)
        scale = (x_max - x_min) / (p_max - p_min)
        p = scale * (p - p_min) + x_min
    return ppg + global_coeff * p


if __name__ == "__main__":
    # config-equivalent hyperparameters (small, lane-friendly demo shapes)
    data_dim = 256          # model_config['data_dim'] (multiple of 128 -> lane-dense stores)
    bz = 8                  # batch
    glonorm = True          # config.glonorm
    global_coeff = 0.5      # config.global_coeff
    x_min, x_max = -1.0, 1.0

    key = jax.random.PRNGKey(0)
    k_prompt, k_ppg = jax.random.split(key)

    # nn.Parameter(torch.randn(1, data_dim)) -> deterministic normal init
    prompt = jax.random.normal(k_prompt, (1, data_dim), dtype=jnp.float32)
    # x['ppg'] : (bz, 1, data_dim)
    ppg = jax.random.normal(k_ppg, (bz, 1, data_dim), dtype=jnp.float32)

    out = prompt_forward(ppg, prompt, glonorm=glonorm, global_coeff=global_coeff,
                         x_min=x_min, x_max=x_max)
    out = jax.block_until_ready(out)

    ref = prompt_forward_ref(ppg, prompt, glonorm=glonorm, global_coeff=global_coeff,
                             x_min=x_min, x_max=x_max)

    assert out.shape == (bz, 1, data_dim)
    assert jnp.allclose(out, ref, atol=1e-5, rtol=1e-5)

    print("KERNEL_OK")
</pallas_src>

<mosaic_0001>
module attributes {stable_mosaic.version = 11 : i64} {
  func.func @_prompt_kernel(%arg0: i32, %arg1: memref<8x256xf32, #tpu.memory_space<vmem>>, %arg2: memref<1x256xf32, #tpu.memory_space<vmem>>, %arg3: memref<8x256xf32, #tpu.memory_space<vmem>>) attributes {dimension_semantics = [#tpu.dimension_semantics<parallel>], iteration_bounds = array<i64: 1>, scalar_prefetch = 0 : i64, scratch_operands = 0 : i64, tpu.core_type = #tpu.core_type<tc>, window_params = [{transform_indices = @transform_0, window_bounds = array<i64: 8, 256>}, {pipeline_mode = #tpu.pipeline_mode<synchronous>, transform_indices = @transform_1, window_bounds = array<i64: 1, 256>}, {transform_indices = @transform_2, window_bounds = array<i64: 8, 256>}]} {
    %c0 = arith.constant 0 : index
    %c0_0 = arith.constant 0 : index
    %0 = vector.load %arg2[%c0, %c0_0] : memref<1x256xf32, #tpu.memory_space<vmem>>, vector<1x256xf32>
    %cst = arith.constant dense<0xFF800000> : vector<1xf32>
    %1 = vector.multi_reduction <maximumf>, %0, %cst [1] : vector<1x256xf32> to vector<1xf32>
    %2 = vector.shape_cast %1 : vector<1xf32> to vector<1x1xf32>
    %cst_1 = arith.constant dense<0x7F800000> : vector<1xf32>
    %3 = vector.multi_reduction <minimumf>, %0, %cst_1 [1] : vector<1x256xf32> to vector<1xf32>
    %4 = vector.shape_cast %3 : vector<1xf32> to vector<1x1xf32>
    %5 = arith.subf %2, %4 : vector<1x1xf32>
    %cst_2 = arith.constant 2.000000e+00 : f32
    %6 = vector.broadcast %cst_2 : f32 to vector<1x1xf32>
    %7 = arith.divf %6, %5 : vector<1x1xf32>
    %8 = vector.broadcast %4 : vector<1x1xf32> to vector<1x256xf32>
    %9 = arith.subf %0, %8 : vector<1x256xf32>
    %10 = vector.broadcast %7 : vector<1x1xf32> to vector<1x256xf32>
    %11 = arith.mulf %10, %9 : vector<1x256xf32>
    %cst_3 = arith.constant -1.000000e+00 : f32
    %12 = vector.broadcast %cst_3 : f32 to vector<1x256xf32>
    %13 = arith.addf %11, %12 : vector<1x256xf32>
    %cst_4 = arith.constant 5.000000e-01 : f32
    %14 = vector.broadcast %cst_4 : f32 to vector<1x256xf32>
    %15 = arith.mulf %14, %13 : vector<1x256xf32>
    %c0_5 = arith.constant 0 : index
    %c0_6 = arith.constant 0 : index
    %16 = vector.load %arg1[%c0_5, %c0_6] : memref<8x256xf32, #tpu.memory_space<vmem>>, vector<8x256xf32>
    %17 = vector.broadcast %15 : vector<1x256xf32> to vector<8x256xf32>
    %18 = arith.addf %16, %17 : vector<8x256xf32>
    %c0_7 = arith.constant 0 : index
    %c0_8 = arith.constant 0 : index
    %19 = vector.load %arg3[%c0_7, %c0_8] : memref<8x256xf32, #tpu.memory_space<vmem>>, vector<8x256xf32>
    tpu.vector_store %arg3[%c0_7, %c0_8], %18 {strides = array<i32>} : memref<8x256xf32, #tpu.memory_space<vmem>>, vector<8x256xf32>,
    return
  }
  func.func @transform_0(%arg0: i32) -> (i32, i32) {
    %c0_i32 = arith.constant 0 : i32
    %c0_i32_0 = arith.constant 0 : i32
    return %arg0, %c0_i32 : i32, i32
  }
  func.func @transform_1(%arg0: i32) -> (i32, i32) {
    %c0_i32 = arith.constant 0 : i32
    %c0_i32_0 = arith.constant 0 : i32
    %c0_i32_1 = arith.constant 0 : i32
    return %c0_i32, %c0_i32_0 : i32, i32
  }
  func.func @transform_2(%arg0: i32) -> (i32, i32) {
    %c0_i32 = arith.constant 0 : i32
    %c0_i32_0 = arith.constant 0 : i32
    return %arg0, %c0_i32 : i32, i32
  }
}

</mosaic_0001>

<bundles_post_ra>
// kernel: tpu_custom_call.1
= control target key start
LH: loop header
LB: loop body
LE: loop exit
PB: predicated region body
PF: predicated region fallthrough
CT: control target
= control target key end

     0   :  { %7 = vsyncpa [#allocation3], 0  ;;  %s199_s0 = inlined_call_operand.hbm [shape: f32[8,256], index: 0, kind: input, shape index: {}]   ;;  %s200_s1 = inlined_call_operand.vmem [shape: f32[1,256], index: 1, kind: input, shape index: {}]   ;;  %s201_s2 = inlined_call_operand.hbm [shape: f32[8,256], index: 2, kind: output, shape index: {}]  }
   0x1   :  { %8 = vsyncpa [#allocation4], 0  ;;  %s155_s9 = smov [#allocation2]   ;;  %s107_s13 = scalar_lea.hbm %s199_s0, 256 }
   0x2   :  { %s15_s10 = sshll.u32 %s155_s9, 4  ;;  %p108_p0 = scmp.ne.s32.totalorder %s199_s0, %s107_s13  ;;  %s16_s10 = int_to_ptr.vmem [resolvable:$true] %s15_s10 }
   0x3   :  { %p111_p1 = scmp.lt.u32.totalorder %s107_s13, %s199_s0 }
   0x5   :  { %p113_p2 = pnand %p111_p1, %p108_p0 }
   0x7   :  { %116 = shalt.err (!%p113_p2)
}
   0x8   :  { %s117_s18 = scalar_lea.vmem %s16_s10, 256  ;;  %p122_p4 = scmp.lt.s32.totalorder %s16_s10, %s16_s10 }
   0x9   :  { %p118_p3 = scmp.ne.s32.totalorder %s16_s10, %s117_s18  ;;  %p123_p5 = scmp.lt.s32.totalorder %s117_s18, %s117_s18 }
   0xb   :  { %p124_p6 = por %p123_p5, %p122_p4 }
   0xd   :  { %p125_p7 = pnand %p124_p6, %p118_p3 }
   0xf   :  { %128 = shalt.err (!%p125_p7)
}
  0x10   :  { %18 = dma.hbm_to_vmem [thread:$0]  %s199_s0, 256, %s16_s10, [#allocation3]  }
  0x11   :  { %151 = dma.done.wait [#allocation3], 256  }
  0x12   :  { %152 = vsyncadd [#allocation3], 4294967040  ;;  %v26_v0 = vlaneseq  ;;  %v24_v4 = vld [vmem:[%s200_s1] sm:$0x3]  ;;  %vm36_vm0 = vcmask 1040384   ;;  %v75_v29 = vld [vmem:[#allocation2 + $0x8] sm:$0xff] }
  0x13   :  { %v74_v28 = vld [vmem:[#allocation2] sm:$0xff]  ;;  %s156_s0 = smov [#allocation5]  }
  0x14   :  { %v27_v1 = vshrl.u32 %v26_v0, 7  ;;  %s94_s1 = sshll.u32 %s156_s0, 4  ;;  %s95_s1 = int_to_ptr.vmem [resolvable:$true] %s94_s1 }
  0x15   :  { %s129_s23 = scalar_lea.vmem %s95_s1, 256  ;;  %p134_p9 = scmp.lt.s32.totalorder %s95_s1, %s95_s1 }
  0x16   :  { %v28_v2 = vsub.s32 0, %v27_v1  ;;  %v32_v3 = vsub.s32 1, %v27_v1  ;;  %p130_p8 = scmp.ne.s32.totalorder %s95_s1, %s129_s23  ;;  %p135_p10 = scmp.lt.s32.totalorder %s129_s23, %s129_s23 }
  0x18   :  { %v29_v5 = vrot.slane %v24_v4, %v28_v2  ;;  %v33_v6 = vrot.slane %v24_v4, %v32_v3  ;;  %p136_p11 = por %p135_p10, %p134_p9 }
  0x1a   :  { %v37_v7 = vsel %vm36_vm0, %v29_v5, -inf  ;;  %v38_v8 = vsel %vm36_vm0, %v33_v6, -inf  ;;  %v42_v9 = vsel %vm36_vm0, %v29_v5, inf  ;;  %v43_v10 = vsel %vm36_vm0, %v33_v6, inf  ;;  %p137_p12 = pnand %p136_p11, %p130_p8 }
  0x1b   :  { %v39_v11 = vmax.f32 %v37_v7, %v38_v8  ;;  %v44_v12 = vmin.f32 %v42_v9, %v43_v10 }
  0x1d   :  { %40 = vmax.xlane.f32.xlu0 %v39_v11 }
  0x21   :  { %45 = vmin.xlane.f32.xlu0 %v44_v12 }
  0xaa   :  { %v41_v13 = vpop.xlane.xlu0 %40 }
  0xae   :  { %v46_v14 = vpop.xlane.xlu0 %45 }
  0xaf   :  { %v47_v15 = vsub.f32 %v41_v13, %v46_v14  ;;  %v54_v16 = vrot.slane %v46_v14, %v28_v2 }
  0xb1   :  { %105 = vrcp.f32 %v47_v15  ;;  %v56_v17 = vsub.f32 %v24_v4, %v54_v16 }
  0xb3   :  { %v61_v20 = vrot.slane %v56_v17, %v28_v2  ;;  %v65_v21 = vrot.slane %v56_v17, %v32_v3 }
  0xbb   :  { %v106_v18 = vpop.eup %105 }
  0xbc   :  { %v49_v19 = vmul.f32 2.0, %v106_v18 }
  0xbe   :  { %v68_v22 = vmul.f32 %v61_v20, %v49_v19  ;;  %v69_v23 = vmul.f32 %v65_v21, %v49_v19 }
  0xc0   :  { %v70_v24 = vadd.f32 -1.0, %v68_v22  ;;  %v71_v25 = vadd.f32 -1.0, %v69_v23 }
  0xc2   :  { %v72_v26 = vmul.f32 0.5, %v70_v24  ;;  %v73_v27 = vmul.f32 0.5, %v71_v25 }
  0xc4   :  { %v79_v30 = vrot.slane %v72_v26, %v28_v2  ;;  %v83_v31 = vrot.slane %v73_v27, %v28_v2 }
  0xc6   :  { %v84_v32 = vadd.f32 %v79_v30, %v74_v28  ;;  %v85_v33 = vadd.f32 %v83_v31, %v75_v29 }
  0xc8   :  { %86 = vst [vmem:[#allocation5] sm:$0xff] %v84_v32  ;;  %87 = vst [vmem:[#allocation5 + $0x8] sm:$0xff] %v85_v33 }
  0xc9   :  { %140 = shalt.err (!%p137_p12)
}
  0xca   :  { %s141_s26 = scalar_lea.hbm %s201_s2, 256 }
  0xcb   :  { %p142_p13 = scmp.ne.s32.totalorder %s201_s2, %s141_s26  ;;  %p145_p0 = scmp.lt.u32.totalorder %s141_s26, %s201_s2 }
  0xcd   :  { %p147_p1 = pnand %p145_p0, %p142_p13 }
  0xcf   :  { %150 = shalt.err (!%p147_p1)
}
  0xd0   :  { %97 = dma.vmem_to_hbm [thread:$0]  %s95_s1, 256, %s201_s2, [#allocation4]  }
  0xd1   :  { %153 = dma.done.wait [#allocation4], 256  }
  0xd2   :  { %154 = vsyncadd [#allocation4], 4294967040 }
  0xd3   :  { %101 = vsyncpa [#allocation3], 1 }
  0xd4   :  { %102 = vsyncpa [#allocation4], 1 }

</bundles_post_ra>
